<compile_context>
chip_gen: v6e
topology: v6e:2x2x1
jax: 0.10.0
libtpu: 0.0.40
codegen_flags: <defaults>
</compile_context>

<pallas_src>
import jax
import jax.numpy as jnp
from jax.experimental import pallas as pl
from jax.experimental.pallas import tpu as pltpu


# ---------------------------------------------------------------------------
# Small helpers
# ---------------------------------------------------------------------------
def _cdiv(a, b):
    return -(-a // b)


def _round_up(a, m):
    return _cdiv(a, m) * m


def _vmem_budget():
    """(working-set budget, vmem_limit_bytes) sized for the local TPU generation."""
    cap = 64 * 1024 * 1024  # conservative fallback (v7x per-TC VMEM)
    try:
        info = pltpu.get_tpu_info()
        c = int(getattr(info, "vmem_capacity_bytes", 0) or 0)
        if c > 0:
            cap = c
    except Exception:
        pass
    limit = int(cap * 0.75)     # 96 MiB on 128 MiB parts, 48 MiB on v7x
    budget = int(cap * 0.55)    # per-step working-set target
    return budget, limit


def _pick_rows(ho, per_row_bytes, fixed_bytes, budget, m_cap_rows):
    """Row-strip height: fill the VMEM budget, then rebalance with cdiv grids."""
    avail = max(budget - fixed_bytes, per_row_bytes)
    th = avail // max(per_row_bytes, 1)
    th = max(1, min(int(th), int(ho), int(m_cap_rows)))
    nt = _cdiv(ho, th)
    th = _cdiv(ho, nt)          # even strips, minimal padding
    nt = _cdiv(ho, th)
    return th, nt


# ---------------------------------------------------------------------------
# Kernels
# ---------------------------------------------------------------------------
def _conv_kernel(xm_ref, xh_ref, wa_ref, wb_ref, b_ref, o_ref):
    # xm_ref: (1, TH, 2, WK+1, 2C)  pair-packed input row strip (rows 2r / 2r+1)
    # xh_ref: (1, 1,  2, WK+1, 2C)  halo pair-row (only its even row is used)
    # wa_ref: (3, 2C, C)            weights for kw in {0,1}, indexed by kh
    # wb_ref: (3,  C, C)            weights for kw == 2,     indexed by kh
    # b_ref : (1,  C)               bias (f32)
    # o_ref : (1, TH, WK, C)        output row strip (WK % 8 == 0, lane-dense C)
    th = o_ref.shape[1]
    wk = o_ref.shape[2]
    c = o_ref.shape[3]
    c2 = 2 * c
    f32 = jnp.float32

    xm = xm_ref[0]                       # (TH, 2, WK+1, 2C)
    ev = xm[:, 0]                        # input rows 2r        (TH, WK+1, 2C)
    od = xm[:, 1]                        # input rows 2r+1
    halo = xh_ref[...][0, :, 0]          # input row 2*(r_last+1)  (1, WK+1, 2C)
    if th > 1:
        ev2 = jnp.concatenate([ev[1:], halo], axis=0)   # rows 2r+2 (TH, WK+1, 2C)
    else:
        ev2 = halo

    def tap(rows, kh):
        # kw in {0,1}: pair j holds columns (2j, 2j+1) as a dense 2C lane vector.
        a = rows[:, :wk, :].reshape(th * wk, c2)
        # kw == 2: column 2j+2 == pair j+1, low C lanes.
        b = rows[:, 1:, :c].reshape(th * wk, c)
        return (jnp.dot(a, wa_ref[kh], preferred_element_type=f32) +
                jnp.dot(b, wb_ref[kh], preferred_element_type=f32))

    acc = tap(ev, 0) + tap(od, 1) + tap(ev2, 2)          # (TH*WK, C) f32
    acc = acc + b_ref[0].astype(f32)
    o_ref[0] = acc.reshape(th, wk, c).astype(o_ref.dtype)


def _pool_kernel(x_ref, o_ref):
    # x_ref: (1, TH, 2, WO, 2C)  pair-packed input (no HBM pre-split)
    # o_ref: (1, TH, WO, C)
    c = o_ref.shape[-1]
    x = x_ref[0]                                          # (TH, 2, WO, 2C)
    s = x[:, 0].astype(jnp.float32) + x[:, 1].astype(jnp.float32)
    o_ref[0] = ((s[..., :c] + s[..., c:]) * 0.25).astype(o_ref.dtype)


# ---------------------------------------------------------------------------
# Wrappers (NHWC internally)
# ---------------------------------------------------------------------------
def _downsample_conv(x, weight_oihw, bias, compute_dtype, out_dtype):
    n, h, w, c = x.shape
    ho = (h - 2) // 2 + 1
    wo = (w - 2) // 2 + 1

    cdt = jnp.dtype(compute_dtype) if compute_dtype is not None else jnp.dtype(x.dtype)
    in_b = cdt.itemsize
    out_b = jnp.dtype(out_dtype).itemsize

    # Kernel-side output width padded to a multiple of 8 so reshapes feeding the
    # matmuls never cross (8,128) tile boundaries; extra columns are sliced off
    # inside the output transpose (free).
    wo_k = max(8, _round_up(wo, 8))
    w1 = wo_k + 1

    budget, limit = _vmem_budget()
    # TODO(synk): for channel counts far beyond VAE sizes (C >> 512) the resident
    # (9C, C) weight block should be tiled over an outer Cout grid axis.
    fixed = 18 * c * c * in_b + 8 * w1 * c * in_b + 8 * c
    per_row = (8 * w1 * c * in_b                    # main block, double-buffered
               + 2 * wo_k * c * out_b               # output block, double-buffered
               + (6 * w1 + 9 * wo_k) * c * in_b     # ev/od/ev2 + tap relayouts
               + 12 * wo_k * c)                     # f32 accumulator / dot results
    m_cap = max(1, 8192 // wo_k)
    th, nt = _pick_rows(ho, per_row, fixed, budget, m_cap)

    # Pad (includes the F.pad (0,1,0,1) zero row/column) and pair-pack.  The
    # transpose + pad + cast + reshape fuse into a single XLA pass; the reshapes
    # themselves are free (adjacent dims only).
    hp2 = nt * th + 1                     # pair-rows incl. the last halo row
    wp = 2 * w1
    xp = jnp.pad(x, ((0, 0), (0, 2 * hp2 - h), (0, wp - w), (0, 0)))
    if xp.dtype != cdt:
        xp = xp.astype(cdt)
    x5 = xp.reshape(n, hp2, 2, w1, 2 * c)

    # torch OIHW -> HWIO, then split into the (kw in {0,1}) and (kw == 2) slabs.
    w_hwio = jnp.transpose(weight_oihw, (2, 3, 1, 0)).astype(cdt)   # (3,3,Cin,Cout)
    wa = w_hwio[:, 0:2].reshape(3, 2 * c, c)                        # (3, 2C, C)
    wb = w_hwio[:, 2]                                               # (3,  C, C)
    b2 = bias.reshape(1, c).astype(jnp.float32)

    out = pl.pallas_call(
        _conv_kernel,
        out_shape=jax.ShapeDtypeStruct((n, ho, wo_k, c), out_dtype),
        grid_spec=pltpu.PrefetchScalarGridSpec(
            num_scalar_prefetch=0,
            grid=(n, nt),
            in_specs=[
                # Main row strip: pair-rows [t*th, (t+1)*th).
                pl.BlockSpec((1, th, 2, w1, 2 * c),
                             lambda b, t: (b, t, 0, 0, 0)),
                # Halo: single pair-row (t+1)*th from the same array (tiny DMA).
                pl.BlockSpec((1, 1, 2, w1, 2 * c),
                             lambda b, t: (b, (t + 1) * th, 0, 0, 0)),
                # Grid-invariant weight / bias blocks: fetched once.
                pl.BlockSpec((3, 2 * c, c), lambda b, t: (0, 0, 0)),
                pl.BlockSpec((3, c, c), lambda b, t: (0, 0, 0)),
                pl.BlockSpec((1, c), lambda b, t: (0, 0)),
            ],
            out_specs=pl.BlockSpec((1, th, wo_k, c), lambda b, t: (b, t, 0, 0)),
        ),
        compiler_params=pltpu.CompilerParams(
            dimension_semantics=("parallel", "parallel"),
            vmem_limit_bytes=limit),
    )(x5, x5, wa, wb, b2)

    return out[:, :, :wo, :]              # drop padded columns (fused w/ transpose)


def _downsample_pool(x, out_dtype):
    n, h, w, c = x.shape
    ho, wo = h // 2, w // 2
    xs = x[:, :2 * ho, :2 * wo, :]                       # floor behaviour (torch)
    x5 = xs.reshape(n, ho, 2, wo, 2 * c)                 # free reshape when even

    in_b = jnp.dtype(x.dtype).itemsize
    out_b = jnp.dtype(out_dtype).itemsize
    budget, limit = _vmem_budget()
    per_row = wo * c * (12 * in_b + 2 * out_b + 20)
    th, nt = _pick_rows(ho, per_row, 0, budget, ho)

    out = pl.pallas_call(
        _pool_kernel,
        out_shape=jax.ShapeDtypeStruct((n, ho, wo, c), out_dtype),
        grid_spec=pltpu.PrefetchScalarGridSpec(
            num_scalar_prefetch=0,
            grid=(n, nt),
            in_specs=[pl.BlockSpec((1, th, 2, wo, 2 * c),
                                   lambda b, t: (b, t, 0, 0, 0))],
            out_specs=pl.BlockSpec((1, th, wo, c), lambda b, t: (b, t, 0, 0)),
        ),
        compiler_params=pltpu.CompilerParams(
            dimension_semantics=("parallel", "parallel"),
            vmem_limit_bytes=limit),
    )(x5)
    return out


# ---------------------------------------------------------------------------
# Public entry point
# ---------------------------------------------------------------------------
def downsample(x, weight_oihw=None, bias=None, *, with_conv=True,
               compute_dtype=jnp.bfloat16, data_format="NCHW"):
    """Forward pass of sd_forge Downsample.

    x            : NCHW (default) or NHWC (data_format="NHWC" skips transposes).
    compute_dtype: matmul operand dtype for the conv path (default bf16; f32
                   accumulation always).  Pass None to keep the input dtype.
    """
    nchw = (data_format == "NCHW")
    x_hwc = jnp.transpose(x, (0, 2, 3, 1)) if nchw else x
    out_dtype = x.dtype

    if with_conv:
        assert weight_oihw is not None and bias is not None
        out = _downsample_conv(x_hwc, weight_oihw, bias, compute_dtype, out_dtype)
    else:
        out = _downsample_pool(x_hwc, out_dtype)

    return jnp.transpose(out, (0, 3, 1, 2)) if nchw else out


# ---------------------------------------------------------------------------
# Pure-JAX reference (for in-script verification only)
# ---------------------------------------------------------------------------
def _reference(x_nchw, weight_oihw, bias, *, with_conv):
    if with_conv:
        xp = jnp.pad(x_nchw, ((0, 0), (0, 0), (0, 1), (0, 1)))
        out = jax.lax.conv_general_dilated(
            xp, weight_oihw, window_strides=(2, 2), padding="VALID",
            dimension_numbers=("NCHW", "OIHW", "NCHW"))
        return out + bias[None, :, None, None]
    summed = jax.lax.reduce_window(
        x_nchw, 0.0, jax.lax.add,
        window_dimensions=(1, 1, 2, 2),
        window_strides=(1, 1, 2, 2),
        padding="VALID")
    return summed * 0.25


# ---------------------------------------------------------------------------
if __name__ == "__main__":
    key = jax.random.PRNGKey(0)
    k_x, k_w, k_b = jax.random.split(key, 3)

    N, C, H, W = 2, 4, 16, 16
    x = jax.random.normal(k_x, (N, C, H, W), dtype=jnp.float32)

    # Deterministic synthetic Conv2d(C, C, 3, 3) parameters (PyTorch OIHW layout).
    weight = jax.random.normal(k_w, (C, C, 3, 3), dtype=jnp.float32) * 0.1
    bias = jax.random.normal(k_b, (C,), dtype=jnp.float32) * 0.1

    ref_conv = _reference(x, weight, bias, with_conv=True)

    # with_conv=True, f32 operands (tight check)
    y_f32 = jax.block_until_ready(
        downsample(x, weight, bias, with_conv=True, compute_dtype=None))
    assert y_f32.shape == (N, C, H // 2, W // 2)
    assert jnp.allclose(y_f32, ref_conv, atol=1e-4, rtol=1e-4)

    # with_conv=True, default bf16 MXU operands / f32 accumulation (loose check)
    y_bf16 = jax.block_until_ready(downsample(x, weight, bias, with_conv=True))
    assert y_bf16.shape == (N, C, H // 2, W // 2)
    assert jnp.allclose(y_bf16, ref_conv, atol=5e-2, rtol=5e-2)

    # with_conv=False path (avg_pool2d)
    y_pool = jax.block_until_ready(downsample(x, with_conv=False))
    ref_pool = _reference(x, None, None, with_conv=False)
    assert y_pool.shape == (N, C, H // 2, W // 2)
    assert jnp.allclose(y_pool, ref_pool, atol=1e-5, rtol=1e-5)

    print("KERNEL_OK")
</pallas_src>

<mosaic_0001>
module attributes {stable_mosaic.version = 11 : i64} {
  func.func @_conv_kernel(%arg0: i32, %arg1: i32, %arg2: memref<1x8x2x9x8xf32, #tpu.memory_space<vmem>>, %arg3: memref<1x1x2x9x8xf32, #tpu.memory_space<vmem>>, %arg4: memref<3x8x4xf32, #tpu.memory_space<vmem>>, %arg5: memref<3x4x4xf32, #tpu.memory_space<vmem>>, %arg6: memref<1x4xf32, #tpu.memory_space<vmem>>, %arg7: memref<1x8x8x4xf32, #tpu.memory_space<vmem>>) attributes {dimension_semantics = [#tpu.dimension_semantics<parallel>, #tpu.dimension_semantics<parallel>], iteration_bounds = array<i64: 2, 1>, scalar_prefetch = 0 : i64, scratch_operands = 0 : i64, tpu.core_type = #tpu.core_type<tc>, window_params = [{transform_indices = @transform_0, window_bounds = array<i64: 1, 8, 2, 9, 8>}, {transform_indices = @transform_1, window_bounds = array<i64: 1, 1, 2, 9, 8>}, {pipeline_mode = #tpu.pipeline_mode<synchronous>, transform_indices = @transform_2, window_bounds = array<i64: 3, 8, 4>}, {pipeline_mode = #tpu.pipeline_mode<synchronous>, transform_indices = @transform_3, window_bounds = array<i64: 3, 4, 4>}, {pipeline_mode = #tpu.pipeline_mode<synchronous>, transform_indices = @transform_4, window_bounds = array<i64: 1, 4>}, {transform_indices = @transform_5, window_bounds = array<i64: 1, 8, 8, 4>}]} {
    %c0 = arith.constant 0 : index
    %c0_0 = arith.constant 0 : index
    %c0_1 = arith.constant 0 : index
    %c0_2 = arith.constant 0 : index
    %c0_3 = arith.constant 0 : index
    %0 = vector.load %arg2[%c0, %c0_0, %c0_1, %c0_2, %c0_3] : memref<1x8x2x9x8xf32, #tpu.memory_space<vmem>>, vector<1x8x2x9x8xf32>
    %1 = vector.shape_cast %0 : vector<1x8x2x9x8xf32> to vector<8x2x9x8xf32>
    %2 = vector.extract_strided_slice %1 {offsets = [0, 0, 0, 0], sizes = [8, 1, 9, 8], strides = [1, 1, 1, 1]} : vector<8x2x9x8xf32> to vector<8x1x9x8xf32>
    %3 = vector.shape_cast %2 : vector<8x1x9x8xf32> to vector<8x9x8xf32>
    %4 = vector.extract_strided_slice %1 {offsets = [0, 1, 0, 0], sizes = [8, 1, 9, 8], strides = [1, 1, 1, 1]} : vector<8x2x9x8xf32> to vector<8x1x9x8xf32>
    %5 = vector.shape_cast %4 : vector<8x1x9x8xf32> to vector<8x9x8xf32>
    %c0_4 = arith.constant 0 : index
    %c0_5 = arith.constant 0 : index
    %c0_6 = arith.constant 0 : index
    %c0_7 = arith.constant 0 : index
    %c0_8 = arith.constant 0 : index
    %6 = vector.load %arg3[%c0_4, %c0_5, %c0_6, %c0_7, %c0_8] : memref<1x1x2x9x8xf32, #tpu.memory_space<vmem>>, vector<1x1x2x9x8xf32>
    %7 = vector.extract_strided_slice %6 {offsets = [0, 0, 0, 0, 0], sizes = [1, 1, 1, 9, 8], strides = [1, 1, 1, 1, 1]} : vector<1x1x2x9x8xf32> to vector<1x1x1x9x8xf32>
    %8 = vector.shape_cast %7 : vector<1x1x1x9x8xf32> to vector<1x9x8xf32>
    %9 = vector.extract_strided_slice %3 {offsets = [1, 0, 0], sizes = [7, 9, 8], strides = [1, 1, 1]} : vector<8x9x8xf32> to vector<7x9x8xf32>
    %10 = tpu.concatenate %9, %8 in 0 : vector<7x9x8xf32>, vector<1x9x8xf32> -> vector<8x9x8xf32>
    %11 = vector.extract_strided_slice %3 {offsets = [0, 0, 0], sizes = [8, 8, 8], strides = [1, 1, 1]} : vector<8x9x8xf32> to vector<8x8x8xf32>
    %12 = vector.shape_cast %11 : vector<8x8x8xf32> to vector<64x8xf32>
    %13 = vector.extract_strided_slice %3 {offsets = [0, 1, 0], sizes = [8, 8, 4], strides = [1, 1, 1]} : vector<8x9x8xf32> to vector<8x8x4xf32>
    %14 = vector.shape_cast %13 : vector<8x8x4xf32> to vector<64x4xf32>
    %c0_9 = arith.constant 0 : index
    %c0_10 = arith.constant 0 : index
    %c0_11 = arith.constant 0 : index
    %15 = vector.load %arg4[%c0_9, %c0_10, %c0_11] : memref<3x8x4xf32, #tpu.memory_space<vmem>>, vector<1x8x4xf32>
    %16 = vector.shape_cast %15 : vector<1x8x4xf32> to vector<8x4xf32>
    %cst = arith.constant dense<0.000000e+00> : vector<64x4xf32>
    %17 = tpu.matmul %12, %16, %cst {dimension_numbers = #tpu.dot_dimension_numbers<[1], [0], [0], [1], [0, 0, 1, 1], [], []>} : vector<64x8xf32>, vector<8x4xf32>, vector<64x4xf32> -> vector<64x4xf32>
    %c0_12 = arith.constant 0 : index
    %c0_13 = arith.constant 0 : index
    %c0_14 = arith.constant 0 : index
    %18 = vector.load %arg5[%c0_12, %c0_13, %c0_14] : memref<3x4x4xf32, #tpu.memory_space<vmem>>, vector<1x4x4xf32>
    %19 = vector.shape_cast %18 : vector<1x4x4xf32> to vector<4x4xf32>
    %cst_15 = arith.constant dense<0.000000e+00> : vector<64x4xf32>
    %20 = tpu.matmul %14, %19, %cst_15 {dimension_numbers = #tpu.dot_dimension_numbers<[1], [0], [0], [1], [0, 0, 1, 1], [], []>} : vector<64x4xf32>, vector<4x4xf32>, vector<64x4xf32> -> vector<64x4xf32>
    %21 = arith.addf %17, %20 : vector<64x4xf32>
    %22 = vector.extract_strided_slice %5 {offsets = [0, 0, 0], sizes = [8, 8, 8], strides = [1, 1, 1]} : vector<8x9x8xf32> to vector<8x8x8xf32>
    %23 = vector.shape_cast %22 : vector<8x8x8xf32> to vector<64x8xf32>
    %24 = vector.extract_strided_slice %5 {offsets = [0, 1, 0], sizes = [8, 8, 4], strides = [1, 1, 1]} : vector<8x9x8xf32> to vector<8x8x4xf32>
    %25 = vector.shape_cast %24 : vector<8x8x4xf32> to vector<64x4xf32>
    %c1 = arith.constant 1 : index
    %c0_16 = arith.constant 0 : index
    %c0_17 = arith.constant 0 : index
    %26 = vector.load %arg4[%c1, %c0_16, %c0_17] : memref<3x8x4xf32, #tpu.memory_space<vmem>>, vector<1x8x4xf32>
    %27 = vector.shape_cast %26 : vector<1x8x4xf32> to vector<8x4xf32>
    %cst_18 = arith.constant dense<0.000000e+00> : vector<64x4xf32>
    %28 = tpu.matmul %23, %27, %cst_18 {dimension_numbers = #tpu.dot_dimension_numbers<[1], [0], [0], [1], [0, 0, 1, 1], [], []>} : vector<64x8xf32>, vector<8x4xf32>, vector<64x4xf32> -> vector<64x4xf32>
    %c1_19 = arith.constant 1 : index
    %c0_20 = arith.constant 0 : index
    %c0_21 = arith.constant 0 : index
    %29 = vector.load %arg5[%c1_19, %c0_20, %c0_21] : memref<3x4x4xf32, #tpu.memory_space<vmem>>, vector<1x4x4xf32>
    %30 = vector.shape_cast %29 : vector<1x4x4xf32> to vector<4x4xf32>
    %cst_22 = arith.constant dense<0.000000e+00> : vector<64x4xf32>
    %31 = tpu.matmul %25, %30, %cst_22 {dimension_numbers = #tpu.dot_dimension_numbers<[1], [0], [0], [1], [0, 0, 1, 1], [], []>} : vector<64x4xf32>, vector<4x4xf32>, vector<64x4xf32> -> vector<64x4xf32>
    %32 = arith.addf %28, %31 : vector<64x4xf32>
    %33 = arith.addf %21, %32 : vector<64x4xf32>
    %34 = vector.extract_strided_slice %10 {offsets = [0, 0, 0], sizes = [8, 8, 8], strides = [1, 1, 1]} : vector<8x9x8xf32> to vector<8x8x8xf32>
    %35 = vector.shape_cast %34 : vector<8x8x8xf32> to vector<64x8xf32>
    %36 = vector.extract_strided_slice %10 {offsets = [0, 1, 0], sizes = [8, 8, 4], strides = [1, 1, 1]} : vector<8x9x8xf32> to vector<8x8x4xf32>
    %37 = vector.shape_cast %36 : vector<8x8x4xf32> to vector<64x4xf32>
    %c2 = arith.constant 2 : index
    %c0_23 = arith.constant 0 : index
    %c0_24 = arith.constant 0 : index
    %38 = vector.load %arg4[%c2, %c0_23, %c0_24] : memref<3x8x4xf32, #tpu.memory_space<vmem>>, vector<1x8x4xf32>
    %39 = vector.shape_cast %38 : vector<1x8x4xf32> to vector<8x4xf32>
    %cst_25 = arith.constant dense<0.000000e+00> : vector<64x4xf32>
    %40 = tpu.matmul %35, %39, %cst_25 {dimension_numbers = #tpu.dot_dimension_numbers<[1], [0], [0], [1], [0, 0, 1, 1], [], []>} : vector<64x8xf32>, vector<8x4xf32>, vector<64x4xf32> -> vector<64x4xf32>
    %c2_26 = arith.constant 2 : index
    %c0_27 = arith.constant 0 : index
    %c0_28 = arith.constant 0 : index
    %41 = vector.load %arg5[%c2_26, %c0_27, %c0_28] : memref<3x4x4xf32, #tpu.memory_space<vmem>>, vector<1x4x4xf32>
    %42 = vector.shape_cast %41 : vector<1x4x4xf32> to vector<4x4xf32>
    %cst_29 = arith.constant dense<0.000000e+00> : vector<64x4xf32>
    %43 = tpu.matmul %37, %42, %cst_29 {dimension_numbers = #tpu.dot_dimension_numbers<[1], [0], [0], [1], [0, 0, 1, 1], [], []>} : vector<64x4xf32>, vector<4x4xf32>, vector<64x4xf32> -> vector<64x4xf32>
    %44 = arith.addf %40, %43 : vector<64x4xf32>
    %45 = arith.addf %33, %44 : vector<64x4xf32>
    %c0_30 = arith.constant 0 : index
    %c0_31 = arith.constant 0 : index
    %46 = vector.load %arg6[%c0_30, %c0_31] : memref<1x4xf32, #tpu.memory_space<vmem>>, vector<1x4xf32>
    %47 = vector.shape_cast %46 : vector<1x4xf32> to vector<4xf32>
    %48 = vector.shape_cast %47 : vector<4xf32> to vector<1x4xf32>
    %49 = vector.broadcast %48 : vector<1x4xf32> to vector<64x4xf32>
    %50 = arith.addf %45, %49 : vector<64x4xf32>
    %51 = vector.shape_cast %50 : vector<64x4xf32> to vector<8x8x4xf32>
    %c0_32 = arith.constant 0 : index
    %c0_33 = arith.constant 0 : index
    %c0_34 = arith.constant 0 : index
    %c0_35 = arith.constant 0 : index
    %52 = vector.load %arg7[%c0_32, %c0_33, %c0_34, %c0_35] : memref<1x8x8x4xf32, #tpu.memory_space<vmem>>, vector<1x8x8x4xf32>
    %53 = vector.shape_cast %52 : vector<1x8x8x4xf32> to vector<8x8x4xf32>
    %54 = vector.shape_cast %51 : vector<8x8x4xf32> to vector<1x8x8x4xf32>
    tpu.vector_store %arg7[%c0_32, %c0_33, %c0_34, %c0_35], %54 {strides = array<i32>} : memref<1x8x8x4xf32, #tpu.memory_space<vmem>>, vector<1x8x8x4xf32>,
    return
  }
  func.func @transform_0(%arg0: i32, %arg1: i32) -> (i32, i32, i32, i32, i32) {
    %c0_i32 = arith.constant 0 : i32
    %c0_i32_0 = arith.constant 0 : i32
    %c0_i32_1 = arith.constant 0 : i32
    %c0_i32_2 = arith.constant 0 : i32
    return %arg0, %arg1, %c0_i32, %c0_i32_0, %c0_i32_1 : i32, i32, i32, i32, i32
  }
  func.func @transform_1(%arg0: i32, %arg1: i32) -> (i32, i32, i32, i32, i32) {
    %c1_i32 = arith.constant 1 : i32
    %0 = arith.addi %arg1, %c1_i32 : i32
    %c8_i32 = arith.constant 8 : i32
    %1 = arith.muli %0, %c8_i32 : i32
    %c0_i32 = arith.constant 0 : i32
    %c0_i32_0 = arith.constant 0 : i32
    %c0_i32_1 = arith.constant 0 : i32
    %c0_i32_2 = arith.constant 0 : i32
    return %arg0, %1, %c0_i32, %c0_i32_0, %c0_i32_1 : i32, i32, i32, i32, i32
  }
  func.func @transform_2(%arg0: i32, %arg1: i32) -> (i32, i32, i32) {
    %c0_i32 = arith.constant 0 : i32
    %c0_i32_0 = arith.constant 0 : i32
    %c0_i32_1 = arith.constant 0 : i32
    %c0_i32_2 = arith.constant 0 : i32
    return %c0_i32, %c0_i32_0, %c0_i32_1 : i32, i32, i32
  }
  func.func @transform_3(%arg0: i32, %arg1: i32) -> (i32, i32, i32) {
    %c0_i32 = arith.constant 0 : i32
    %c0_i32_0 = arith.constant 0 : i32
    %c0_i32_1 = arith.constant 0 : i32
    %c0_i32_2 = arith.constant 0 : i32
    return %c0_i32, %c0_i32_0, %c0_i32_1 : i32, i32, i32
  }
  func.func @transform_4(%arg0: i32, %arg1: i32) -> (i32, i32) {
    %c0_i32 = arith.constant 0 : i32
    %c0_i32_0 = arith.constant 0 : i32
    %c0_i32_1 = arith.constant 0 : i32
    return %c0_i32, %c0_i32_0 : i32, i32
  }
  func.func @transform_5(%arg0: i32, %arg1: i32) -> (i32, i32, i32, i32) {
    %c0_i32 = arith.constant 0 : i32
    %c0_i32_0 = arith.constant 0 : i32
    %c0_i32_1 = arith.constant 0 : i32
    return %arg0, %arg1, %c0_i32, %c0_i32_0 : i32, i32, i32, i32
  }
}

</mosaic_0001>

<bundles_post_ra>
// kernel: tpu_custom_call.1
= control target key start
LH: loop header
LB: loop body
LE: loop exit
PB: predicated region body
PF: predicated region fallthrough
CT: control target
= control target key end

     0   :  { %s1624_s18 = smov 0   ;;  %s1626_s19 = smov 0   ;;  %s1891_s0 = inlined_call_operand.vmem [shape: f32[2,9,2,9,8], index: 0, kind: input, shape index: {}]   ;;  %s1892_s1 = inlined_call_operand.vmem [shape: f32[2,9,2,9,8], index: 1, kind: input, shape index: {}]   ;;  %s1893_s2 = inlined_call_operand.vmem [shape: f32[3,8,4], index: 2, kind: input, shape index: {}]   ;;  %s1894_s3 = inlined_call_operand.vmem [shape: f32[3,4,4], index: 3, kind: input, shape index: {}]   ;;  %s1895_s4 = inlined_call_operand.vmem [shape: f32[1,4], index: 4, kind: input, shape index: {}]   ;;  %s1896_s5 = inlined_call_operand.vmem [shape: f32[2,8,8,4], index: 5, kind: output, shape index: {}]  }
   0x1   :  { %s1628_s20 = smov 0  }
   0x2 LB: > { %s27_s21 = sadd.s32 1, %s1588_s19  ;;  %p1339_p0 = scmp.ge.s32.totalorder %s1592_s20, 1  ;;  %s1592_s20 = sphi %s1628_s20, %s15_s20   ;;  %s1588_s19 = sphi %s1626_s19, %s1898_s19   ;;  %s1584_s18 = sphi %s1624_s18, %s1897_s18  }
   0x3   : > { %p29_p1 = scmp.ge.s32.totalorder %s27_s21, 2  ;;  %p245_p2 = scmp.lt.s32.totalorder %s1592_s20, 3 }
   0x5   : > { %s1900_s21 = smov (%p29_p1, %s27_s21), 0  ;;  %p246_p3 = pnand %p1339_p0, %p245_p2 }
   0x6   : > { %p306_p4 = scmp.lt.s32.totalorder (!%p246_p3), %s1584_s18, 1 }
   0x7   : > { %249 = sbr.rel (%p246_p3) target bundleno = 267 (0x10b), region = 40 }
   0xc   : > { %v420_v0 = vld [vmem:[%s1893_s2] sm:$0xff]  ;;  %vm439_vm0 = vcmask 1043456   ;;  %v1361_v3 = vld [vmem:[%s1893_s2 + $0x8] sm:$0xff]  ;;  %s1902_s18 = smov (!%p306_p4, %s1584_s18), 1  ;;  %vm548_vm1 = vcmask 64512   ;;  %v1670_v4 = vld [vmem:[%s1893_s2 + $0x10] sm:$0xff] }
   0xd   : > { %v421_v1 = vld [vmem:[%s1894_s3] sm:$0xf]  ;;  %1473 = vmatprep.subr.mxu1 %v420_v0  ;;  %v1362_v2 = vld [vmem:[%s1894_s3 + $0x4] sm:$0xf]  ;;  %s1543_s30 = smul.u32 288, %s1902_s18  ;;  %vm395_vm2 = vcmask 1046528  }
   0xe   : > { %1459 = vmatprep.subr.msk.mxu0 %vm439_vm0, %v421_v1  ;;  %1474 = vmatpush3.msra.mxu1 %v420_v0  ;;  %vm422_vm3 = vcmask 31744   ;;  %v1381_v32 = vld [vmem:[%s1894_s3 + $0x8] sm:$0xf]  ;;  %s1404_s17 = sshll.u32 %s1902_s18, 6 }
   0xf   : > { %1460 = vmatpush3.msk.msra.mxu0 %vm439_vm0, %v421_v1  ;;  %1501 = vmatprep.subr.mxu1 %v1361_v3  ;;  %s1665_s8 = scalar_lea.vmem %s1891_s0, %s1543_s30  ;;  %s1403_s13 = sadd.s32 256, %s1543_s30 }
  0x10   : > { %1487 = vmatprep.subr.msk.mxu0 %vm439_vm0, %v1362_v2  ;;  %v345_v5 = vld [vmem:[%s1665_s8] sm:$0xff]  ;;  %v346_v7 = vld [vmem:[%s1665_s8 + $0x8] sm:$0x1]  ;;  %v347_v41 = vld [vmem:[%s1665_s8 + $0x10] sm:$0xff]  ;;  %s332_s16 = scalar_lea.vmem %s1892_s1, %s1403_s13  ;;  %s1860_s26 = scalar_lea.vmem %s1896_s5, %s1404_s17 }
  0x11   : > { %v1674_v6 = vld [vmem:[%s1665_s8 + $0x20] sm:$0xff]  ;;  %v396_v8 = vrot.slane %v345_v5, 1  ;;  %1475 = vmatprep.mubr.msk.f32.mxu1 %vm548_vm1, %v345_v5  ;;  %v397_v10 = vrot.slane %v346_v7, 1  ;;  %v350_v11 = vld [vmem:[%s1665_s8 + $0x28] sm:$0x1]  ;;  %v686_v47 = vrot.slane %v347_v41, 1 }
  0x12   : > { %v399_v9 = vrot.slane %v1674_v6, 1  ;;  %v1681_v12 = vld [vmem:[%s1665_s8 + $0x40] sm:$0xff]  ;;  %1476 = vmatmul.mubr.msk.f32.vlgmr.msra.gmra.mxu1 %vm548_vm1, %v1674_v6  ;;  %v400_v13 = vrot.slane %v350_v11, 1  ;;  %v354_v16 = vld [vmem:[%s1665_s8 + $0x48] sm:$0x1]  ;;  %v351_v48 = vld [vmem:[%s1665_s8 + $0x30] sm:$0xff] }
  0x13   : > { %v402_v14 = vrot.slane %v1681_v12, 1  ;;  %v1687_v15 = vld [vmem:[%s1665_s8 + $0x60] sm:$0xff]  ;;  %v398_v18 = vsel %vm395_vm2, %v396_v8, %v397_v10  ;;  %1502 = vmatpush3.msra.mxu1 %v1361_v3  ;;  %1478 = vmatprep.mubr.msk.f32.mxu1 %vm548_vm1, %v1681_v12  ;;  %v403_v20 = vrot.slane %v354_v16, 1  ;;  %v358_v21 = vld [vmem:[%s1665_s8 + $0x68] sm:$0x1]  ;;  %v355_v51 = vld [vmem:[%s1665_s8 + $0x50] sm:$0xff] }
  0x14   : > { %v1691_v17 = vld [vmem:[%s1665_s8 + $0x80] sm:$0xff]  ;;  %v405_v19 = vrot.slane %v1687_v15, 1  ;;  %1461 = vmatprep.mubr.msk.f32.mxu0 %vm422_vm3, %v398_v18  ;;  %v1704_v24 = vsel %vm395_vm2, %v399_v9, %v400_v13  ;;  %v406_v25 = vrot.slane %v358_v21, 1  ;;  %v362_v26 = vld [vmem:[%s1665_s8 + $0x88] sm:$0x1]  ;;  %1529 = vmatprep.subr.mxu1 %v1670_v4  ;;  %v689_v54 = vrot.slane %v351_v48, 1 }
  0x15   : > { %v408_v22 = vrot.slane %v1691_v17, 1  ;;  %v1700_v23 = vld [vmem:[%s1665_s8 + $0xa0] sm:$0xff]  ;;  %v366_v27 = vld [vmem:[%s1665_s8 + $0xa8] sm:$0x1]  ;;  %1462 = vmatmul.mubr.msk.f32.vlgmr.msra.gmra.mxu0 %vm422_vm3, %v1704_v24  ;;  %v1712_v28 = vsel %vm395_vm2, %v402_v14, %v403_v20  ;;  %v409_v29 = vrot.slane %v362_v26, 1  ;;  %v359_v57 = vld [vmem:[%s1665_s8 + $0x70] sm:$0xff] }
  0x16   : > { %v1715_v30 = vld [vmem:[%s1665_s8 + $0xc0] sm:$0xff]  ;;  %v370_v31 = vld [vmem:[%s1665_s8 + $0xc8] sm:$0x1]  ;;  %1488 = vmatpush3.msk.msra.mxu0 %vm439_vm0, %v1362_v2  ;;  %1479 = vmatmul.mubr.msk.f32.gmra.mxu1 %vm548_vm1, %v1687_v15  ;;  %v1725_v33 = vsel %vm395_vm2, %v405_v19, %v406_v25  ;;  %v411_v34 = vrot.slane %v1700_v23, 1  ;;  %v412_v35 = vrot.slane %v366_v27, 1  ;;  %v692_v59 = vrot.slane %v355_v51, 1 }
  0x17   : > { %1464 = vmatprep.mubr.msk.f32.mxu0 %vm422_vm3, %v1712_v28  ;;  %1481 = vmatprep.mubr.msk.f32.mxu1 %vm548_vm1, %v1691_v17  ;;  %v1733_v36 = vsel %vm395_vm2, %v408_v22, %v409_v29  ;;  %v414_v37 = vrot.slane %v1715_v30, 1  ;;  %v1737_v38 = vld [vmem:[%s1665_s8 + $0xe0] sm:$0xff]  ;;  %v415_v39 = vrot.slane %v370_v31, 1  ;;  %v374_v40 = vld [vmem:[%s1665_s8 + $0xe8] sm:$0x1]  ;;  %v363_v61 = vld [vmem:[%s1665_s8 + $0x90] sm:$0xff] }
  0x18   : > { %v348_v42 = vld [vmem:[%s1665_s8 + $0x18] sm:$0x1]  ;;  %1515 = vmatprep.subr.msk.mxu0 %vm439_vm0, %v1381_v32  ;;  %v1750_v43 = vsel %vm395_vm2, %v411_v34, %v412_v35  ;;  %v417_v44 = vrot.slane %v1737_v38, 1  ;;  %v418_v45 = vrot.slane %v374_v40, 1  ;;  %v695_v0 = vrot.slane %v359_v57, 1  ;;  %v367_v3 = vld [vmem:[%s1665_s8 + $0xb0] sm:$0xff] }
  0x19   : > { %1465 = vmatmul.mubr.msk.f32.gmra.mxu0 %vm422_vm3, %v1725_v33  ;;  %v1756_v46 = vsel %vm395_vm2, %v414_v37, %v415_v39  ;;  %v687_v49 = vrot.slane %v348_v42, 1  ;;  %v352_v50 = vld [vmem:[%s1665_s8 + $0x38] sm:$0x1]  ;;  %v698_v2 = vrot.slane %v363_v61, 1  ;;  %v371_v9 = vld [vmem:[%s1665_s8 + $0xd0] sm:$0xff]  ;;  %v701_v11 = vrot.slane %v367_v3, 1 }
  0x1a   : > { %1482 = vmatmul.mubr.msk.f32.gmra.mxu1 %vm548_vm1, %v1700_v23  ;;  %1467 = vmatprep.mubr.msk.f32.mxu0 %vm422_vm3, %v1733_v36  ;;  %v356_v52 = vld [vmem:[%s1665_s8 + $0x58] sm:$0x1]  ;;  %v1769_v53 = vsel %vm395_vm2, %v417_v44, %v418_v45  ;;  %v690_v55 = vrot.slane %v352_v50, 1  ;;  %v704_v16 = vrot.slane %v371_v9, 1  ;;  %v375_v18 = vld [vmem:[%s1665_s8 + $0xf0] sm:$0xff] }
  0x1b   : > { %1484 = vmatprep.mubr.msk.f32.mxu1 %vm548_vm1, %v1715_v30  ;;  %v688_v56 = vsel %vm395_vm2, %v686_v47, %v687_v49  ;;  %v360_v58 = vld [vmem:[%s1665_s8 + $0x78] sm:$0x1]  ;;  %v693_v60 = vrot.slane %v356_v52, 1  ;;  %v707_v22 = vrot.slane %v375_v18, 1 }
  0x1c   : > { %v364_v62 = vld [vmem:[%s1665_s8 + $0x98] sm:$0x1]  ;;  %v691_v63 = vsel %vm395_vm2, %v689_v54, %v690_v55  ;;  %v696_v1 = vrot.slane %v360_v58, 1 }
  0x1d   : > { %1468 = vmatmul.mubr.msk.f32.gmra.mxu0 %vm422_vm3, %v1750_v43  ;;  %v699_v5 = vrot.slane %v364_v62, 1  ;;  %v368_v7 = vld [vmem:[%s1665_s8 + $0xb8] sm:$0x1]  ;;  %v694_v8 = vsel %vm395_vm2, %v692_v59, %v693_v60 }
  0x1e   : > { %1485 = vmatmul.mubr.msk.f32.gmra.mxu1 %vm548_vm1, %v1737_v38  ;;  %1470 = vmatprep.mubr.msk.f32.mxu0 %vm422_vm3, %v1756_v46  ;;  %v372_v10 = vld [vmem:[%s1665_s8 + $0xd8] sm:$0x1]  ;;  %v702_v13 = vrot.slane %v368_v7, 1 }
  0x1f   : > { %1503 = vmatprep.mubr.msk.f32.mxu1 %vm548_vm1, %v347_v41  ;;  %v700_v14 = vsel %vm395_vm2, %v698_v2, %v699_v5  ;;  %v705_v19 = vrot.slane %v372_v10, 1  ;;  %v376_v20 = vld [vmem:[%s1665_s8 + $0xf8] sm:$0x1] }
  0x20   : > { %v703_v21 = vsel %vm395_vm2, %v701_v11, %v702_v13  ;;  %v708_v25 = vrot.slane %v376_v20, 1 }
  0x21   : > { %1471 = vmatmul.mubr.msk.f32.gmra.mxu0 %vm422_vm3, %v1769_v53  ;;  %v706_v26 = vsel %vm395_vm2, %v704_v16, %v705_v19 }
  0x22   : > { %1504 = vmatmul.mubr.msk.f32.vlgmr.msra.gmra.mxu1 %vm548_vm1, %v351_v48  ;;  %1489 = vmatprep.mubr.msk.f32.mxu0 %vm422_vm3, %v688_v56  ;;  %v709_v27 = vsel %vm395_vm2, %v707_v22, %v708_v25 }
  0x23   : > { %1530 = vmatpush3.msra.mxu1 %v1670_v4  ;;  %1506 = vmatprep.mubr.msk.f32.mxu1 %vm548_vm1, %v355_v51  ;;  %v697_v4 = vsel %vm395_vm2, %v695_v0, %v696_v1 }
  0x25   : > { %1490 = vmatmul.mubr.msk.f32.vlgmr.msra.gmra.mxu0 %vm422_vm3, %v691_v63 }
  0x26   : > { %1516 = vmatpush3.msk.msra.mxu0 %vm439_vm0, %v1381_v32  ;;  %1507 = vmatmul.mubr.msk.f32.gmra.mxu1 %vm548_vm1, %v359_v57 }
  0x27   : > { %1492 = vmatprep.mubr.msk.f32.mxu0 %vm422_vm3, %v694_v8  ;;  %1509 = vmatprep.mubr.msk.f32.mxu1 %vm548_vm1, %v363_v61 }
  0x29   : > { %1493 = vmatmul.mubr.msk.f32.gmra.mxu0 %vm422_vm3, %v697_v4 }
  0x2a   : > { %1510 = vmatmul.mubr.msk.f32.gmra.mxu1 %vm548_vm1, %v367_v3  ;;  %1495 = vmatprep.mubr.msk.f32.mxu0 %vm422_vm3, %v700_v14 }
  0x2b   : > { %1512 = vmatprep.mubr.msk.f32.mxu1 %vm548_vm1, %v371_v9  ;;  %v1399_v9 = vld [vmem:[%s1895_s4] ss:$0 sm:$0xff] }
  0x2d   : > { %1496 = vmatmul.mubr.msk.f32.gmra.mxu0 %vm422_vm3, %v703_v21 }
  0x2e   : > { %1513 = vmatmul.mubr.msk.f32.gmra.mxu1 %vm548_vm1, %v375_v18  ;;  %1498 = vmatprep.mubr.msk.f32.mxu0 %vm422_vm3, %v706_v26 }
  0x2f   : > { %1531 = vmatprep.mubr.msk.f32.mxu1 %vm548_vm1, %v1674_v6  ;;  %v377_v6 = vld [vmem:[%s332_s16] sm:$0xff] }
  0x31   : > { %1499 = vmatmul.mubr.msk.f32.gmra.mxu0 %vm422_vm3, %v709_v27 }
  0x32   : > { %1532 = vmatmul.mubr.msk.f32.vlgmr.msra.gmra.mxu1 %vm548_vm1, %v1681_v12  ;;  %1517 = vmatprep.mubr.msk.f32.mxu0 %vm422_vm3, %v1704_v24  ;;  %v378_v12 = vld [vmem:[%s332_s16 + $0x8] sm:$0x1] }
  0x33   : > { %1534 = vmatprep.mubr.msk.f32.mxu1 %vm548_vm1, %v1687_v15  ;;  %v969_v15 = vrot.slane %v377_v6, 1  ;;  %v970_v24 = vrot.slane %v378_v12, 1 }
  0x35   : > { %1518 = vmatmul.mubr.msk.f32.vlgmr.msra.gmra.mxu0 %vm422_vm3, %v1712_v28 }
  0x36   : > { %1535 = vmatmul.mubr.msk.f32.gmra.mxu1 %vm548_vm1, %v1691_v17  ;;  %1520 = vmatprep.mubr.msk.f32.mxu0 %vm422_vm3, %v1725_v33  ;;  %v971_v17 = vsel %vm395_vm2, %v969_v15, %v970_v24 }
  0x37   : > { %1537 = vmatprep.mubr.msk.f32.mxu1 %vm548_vm1, %v1700_v23 }
  0x39   : > { %1521 = vmatmul.mubr.msk.f32.gmra.mxu0 %vm422_vm3, %v1733_v36 }
  0x3a   : > { %1538 = vmatmul.mubr.msk.f32.gmra.mxu1 %vm548_vm1, %v1715_v30  ;;  %1523 = vmatprep.mubr.msk.f32.mxu0 %vm422_vm3, %v1750_v43 }
  0x3b   : > { %1540 = vmatprep.mubr.msk.f32.mxu1 %vm548_vm1, %v1737_v38 }
  0x3d   : > { %1524 = vmatmul.mubr.msk.f32.gmra.mxu0 %vm422_vm3, %v1756_v46 }
  0x3e   : > { %1541 = vmatmul.mubr.msk.f32.gmra.mxu1 %vm548_vm1, %v377_v6  ;;  %1526 = vmatprep.mubr.msk.f32.mxu0 %vm422_vm3, %v1769_v53 }
  0x41   : > { %1527 = vmatmul.mubr.msk.f32.gmra.mxu0 %vm422_vm3, %v971_v17 }
  0xd2   : > { %v1477_v23 = vpop.f32.mrf.mxu1 }
  0xd4   : > { %v631_v28 = vpop.f32.mrf.mxu1 }
  0xd5   : > { %v1463_v29 = vpop.f32.mrf.mxu0 }
  0xd6   : > { %v1480_v30 = vpop.f32.mrf.mxu1  ;;  %v637_v61 = vadd.f32 %v1477_v23, %v1463_v29 }
  0xd7   : > { %v509_v31 = vpop.f32.mrf.mxu0 }
  0xd8   : > { %v641_v32 = vpop.f32.mrf.mxu1  ;;  %v632_v1 = vadd.f32 %v631_v28, %v509_v31 }
  0xd9   : > { %v1466_v33 = vpop.f32.mrf.mxu0 }
  0xda   : > { %v1483_v34 = vpop.f32.mrf.mxu1  ;;  %v647_v8 = vadd.f32 %v1480_v30, %v1466_v33 }
  0xdb   : > { %v519_v35 = vpop.f32.mrf.mxu0 }
  0xdc   : > { %v651_v36 = vpop.f32.mrf.mxu1  ;;  %v642_v18 = vadd.f32 %v641_v32, %v519_v35 }
  0xdd   : > { %v1469_v37 = vpop.f32.mrf.mxu0 }
  0xde   : > { %v1845_v38 = vpop.f32.mrf.mxu1  ;;  %v657_v6 = vadd.f32 %v1483_v34, %v1469_v37 }
  0xdf   : > { %v529_v39 = vpop.f32.mrf.mxu0 }
  0xe0   : > { %v1847_v40 = vpop.f32.mrf.mxu1  ;;  %v652_v30 = vadd.f32 %v651_v36, %v529_v39 }
  0xe1   : > { %v1849_v41 = vpop.f32.mrf.mxu0 }
  0xe2   : > { %v1505_v42 = vpop.f32.mrf.mxu1  ;;  %v667_v37 = vadd.f32 %v1845_v38, %v1849_v41 }
  0xe3   : > { %v1851_v43 = vpop.f32.mrf.mxu0 }
  0xe4   : > { %v920_v44 = vpop.f32.mrf.mxu1 }
  0xe5   : > { %v1491_v45 = vpop.f32.mrf.mxu0 }
  0xe6   : > { %v1508_v46 = vpop.f32.mrf.mxu1  ;;  %v926_v58 = vadd.f32 %v1505_v42, %v1491_v45 }
  0xe7   : > { %v799_v47 = vpop.f32.mrf.mxu0 }
  0xe8   : > { %v930_v48 = vpop.f32.mrf.mxu1  ;;  %v921_v62 = vadd.f32 %v920_v44, %v799_v47  ;;  %v960_v2 = vadd.f32 %v926_v58, %v637_v61 }
  0xe9   : > { %v1494_v49 = vpop.f32.mrf.mxu0 }
  0xea   : > { %v1511_v50 = vpop.f32.mrf.mxu1  ;;  %v936_v3 = vadd.f32 %v1508_v46, %v1494_v49  ;;  %v959_v4 = vadd.f32 %v921_v62, %v632_v1  ;;  %v662_v49 = vadd.f32 %v1847_v40, %v1851_v43 }
  0xeb   : > { %v809_v51 = vpop.f32.mrf.mxu0 }
  0xec   : > { %v940_v52 = vpop.f32.mrf.mxu1  ;;  %v931_v11 = vadd.f32 %v930_v48, %v809_v51  ;;  %v962_v21 = vadd.f32 %v936_v3, %v647_v8 }
  0xed   : > { %v1497_v53 = vpop.f32.mrf.mxu0 }
  0xee   : > { %v1514_v54 = vpop.f32.mrf.mxu1  ;;  %v946_v19 = vadd.f32 %v1511_v50, %v1497_v53  ;;  %v961_v24 = vadd.f32 %v931_v11, %v642_v18 }
  0xef   : > { %v819_v55 = vpop.f32.mrf.mxu0 }
  0xf0   : > { %v950_v56 = vpop.f32.mrf.mxu1  ;;  %v941_v12 = vadd.f32 %v940_v52, %v819_v55  ;;  %v964_v31 = vadd.f32 %v946_v19, %v657_v6 }
  0xf1   : > { %v1500_v57 = vpop.f32.mrf.mxu0 }
  0xf2   : > { %v1533_v59 = vpop.f32.mrf.mxu1  ;;  %v956_v33 = vadd.f32 %v1514_v54, %v1500_v57  ;;  %v963_v44 = vadd.f32 %v941_v12, %v652_v30 }
  0xf3   : > { %v829_v60 = vpop.f32.mrf.mxu0 }
  0xf4   : > { %v1154_v63 = vpop.f32.mrf.mxu1  ;;  %v951_v47 = vadd.f32 %v950_v56, %v829_v60  ;;  %v966_v51 = vadd.f32 %v956_v33, %v667_v37 }
  0xf5   : > { %v1519_v0 = vpop.f32.mrf.mxu0 }
  0xf6   : > { %v1160_v5 = vadd.f32 %v1533_v59, %v1519_v0  ;;  %v1536_v7 = vpop.f32.mrf.mxu1  ;;  %v965_v55 = vadd.f32 %v951_v47, %v662_v49 }
  0xf7   : > { %v1047_v10 = vpop.f32.mrf.mxu0 }
  0xf8   : > { %v1194_v13 = vadd.f32 %v1160_v5, %v960_v2  ;;  %v1155_v14 = vadd.f32 %v1154_v63, %v1047_v10  ;;  %v1164_v16 = vpop.f32.mrf.mxu1 }
  0xf9   : > { %v1522_v20 = vpop.f32.mrf.mxu0 }
  0xfa   : > { %v1209_v22 = vadd.f32 %v1399_v9, %v1194_v13  ;;  %v1193_v25 = vadd.f32 %v1155_v14, %v959_v4  ;;  %v1170_v26 = vadd.f32 %v1536_v7, %v1522_v20  ;;  %v1539_v27 = vpop.f32.mrf.mxu1 }
  0xfb   : > { %v1057_v15 = vpop.f32.mrf.mxu0 }
  0xfc   : > { %1217 = vst.msk [vmem:[%s1860_s26 + $0x8] sm:$0xff] %vm422_vm3, %v1209_v22  ;;  %v1208_v17 = vadd.f32 %v1399_v9, %v1193_v25  ;;  %v1196_v23 = vadd.f32 %v1170_v26, %v962_v21  ;;  %v1165_v28 = vadd.f32 %v1164_v16, %v1057_v15  ;;  %v1174_v29 = vpop.f32.mrf.mxu1 }
  0xfd   : > { %v1525_v32 = vpop.f32.mrf.mxu0 }
  0xfe   : > { %1216 = vst.msk [vmem:[%s1860_s26] sm:$0xff] %vm422_vm3, %v1208_v17  ;;  %v1211_v35 = vadd.f32 %v1399_v9, %v1196_v23  ;;  %v1195_v42 = vadd.f32 %v1165_v28, %v961_v24  ;;  %v1180_v34 = vadd.f32 %v1539_v27, %v1525_v32  ;;  %v1542_v46 = vpop.f32.mrf.mxu1 }
  0xff   : > { %v1067_v45 = vpop.f32.mrf.mxu0 }
 0x100   : > { %1219 = vst.msk [vmem:[%s1860_s26 + $0x18] sm:$0xff] %vm422_vm3, %v1211_v35  ;;  %v1210_v36 = vadd.f32 %v1399_v9, %v1195_v42  ;;  %v1198_v39 = vadd.f32 %v1180_v34, %v964_v31  ;;  %v1175_v48 = vadd.f32 %v1174_v29, %v1067_v45  ;;  %v1184_v53 = vpop.f32.mrf.mxu1 }
 0x101   : > { %v1528_v50 = vpop.f32.mrf.mxu0 }
 0x102   : > { %1218 = vst.msk [vmem:[%s1860_s26 + $0x10] sm:$0xff] %vm422_vm3, %v1210_v36  ;;  %v1213_v38 = vadd.f32 %v1399_v9, %v1198_v39  ;;  %v1197_v41 = vadd.f32 %v1175_v48, %v963_v44  ;;  %v1190_v52 = vadd.f32 %v1542_v46, %v1528_v50 }
 0x103   : > { %v1077_v54 = vpop.f32.mrf.mxu0 }
 0x104   : > { %1221 = vst.msk [vmem:[%s1860_s26 + $0x28] sm:$0xff] %vm422_vm3, %v1213_v38  ;;  %v1212_v56 = vadd.f32 %v1399_v9, %v1197_v41  ;;  %v1200_v57 = vadd.f32 %v1190_v52, %v966_v51  ;;  %v1185_v58 = vadd.f32 %v1184_v53, %v1077_v54 }
 0x106   : > { %1220 = vst.msk [vmem:[%s1860_s26 + $0x20] sm:$0xff] %vm422_vm3, %v1212_v56  ;;  %v1215_v40 = vadd.f32 %v1399_v9, %v1200_v57  ;;  %v1199_v43 = vadd.f32 %v1185_v58, %v965_v55 }
 0x108   : > { %1223 = vst.msk [vmem:[%s1860_s26 + $0x38] sm:$0xff] %vm422_vm3, %v1215_v40  ;;  %v1214_v59 = vadd.f32 %v1399_v9, %v1199_v43 }
 0x10a   : > { %1222 = vst.msk [vmem:[%s1860_s26 + $0x30] sm:$0xff] %vm422_vm3, %v1214_v59 }
 0x10b PF: > { %s15_s20 = sadd.s32 1, %s1592_s20   ;;  %s1897_s18 = smov %s1588_s19 }
 0x10c   : > { %p12_p5 = scmp.ge.s32.totalorder %s15_s20, 4   ;;  %s1898_s19 = smov %s1900_s21 }
 0x10e   :  { %14 = sbr.rel (!%p12_p5) target bundleno = 2 (0x2), region = 77 }

</bundles_post_ra>
